<compile_context>
chip_gen: v5e
topology: v5e:2x2
jax: 0.10.0
libtpu: 0.0.40
codegen_flags: <defaults>
</compile_context>

<pallas_src>
import jax
import jax.numpy as jnp
from jax.experimental import pallas as pl
from jax.experimental.pallas import tpu as pltpu
import numpy as np


def _round_up(x, m):
    return ((x + m - 1) // m) * m


def _apply_gates(v, c, H):
    """v: (tb, 4H) f32 gate pre-activations; c: (tb, H) f32 -> (y_t, c_t)."""
    # sigmoid(x) = 0.5 * tanh(0.5 * x) + 0.5  -> one EUP op per gate element;
    # the extra mul/add ride in otherwise-idle VALU slots.
    g = 0.5 * jnp.tanh(0.5 * v[:, : 3 * H]) + 0.5
    forget_g = g[:, 0 * H:1 * H]
    input_g = g[:, 1 * H:2 * H]
    output_g = g[:, 2 * H:3 * H]
    main_g = v[:, 3 * H:4 * H]                  # main gate has no activation
    c_t = jnp.tanh(c * forget_g + main_g * input_g)
    return c_t * output_g, c_t


def _lstm_kernel_fused(xy_ref, c_ref, w_ref, b_ref, out_ref):
    """Small-K path: single MXU dot with K = D + H (wrapper concatenated xy)."""
    H = c_ref.shape[-1]
    v = jnp.dot(xy_ref[...], w_ref[...],
                preferred_element_type=jnp.float32) + b_ref[...]
    y_t, c_t = _apply_gates(v, c_ref[...].astype(jnp.float32), H)
    out_ref[...] = jnp.concatenate([y_t, c_t], axis=-1).astype(out_ref.dtype)


def _lstm_kernel_split(x_ref, y_ref, c_ref, wx_ref, wy_ref, b_ref, out_ref):
    """Large-K path: x@Wx + y@Wy, avoiding a big activation concat per step."""
    H = c_ref.shape[-1]
    v = (jnp.dot(x_ref[...], wx_ref[...], preferred_element_type=jnp.float32)
         + jnp.dot(y_ref[...], wy_ref[...], preferred_element_type=jnp.float32)
         + b_ref[...])
    y_t, c_t = _apply_gates(v, c_ref[...].astype(jnp.float32), H)
    out_ref[...] = jnp.concatenate([y_t, c_t], axis=-1).astype(out_ref.dtype)


def lstm_cell(x_t, states, params):
    """_LSTMCell.forward.

    x_t: (B, D); states = (y_tm1, c_tm1), each (B, H);
    params: W (D+H, 4H), b (1, 4H).  Returns (y_t, c_t), each (B, H).
    """
    y_tm1, c_tm1 = states
    B, D = x_t.shape
    H = y_tm1.shape[1]
    G = 4 * H
    W, b = params["W"], params["b"]
    assert W.shape == (D + H, G) and b.shape == (1, G)
    out_dtype = x_t.dtype

    # ---- batch tiling -----------------------------------------------------
    # 8-aligned tiles, large enough to amortize per-grid-step overhead but
    # bounded so the (tb, 4H) f32 gate intermediate doesn't spill vregs; when
    # B >= 16 force >= 2 programs so v7x's two TensorCores both get work.
    cap = 512 if H <= 128 else 256
    if B >= 16:
        tb = min(cap, _round_up(pl.cdiv(B, 2), 8))
    else:
        tb = _round_up(B, 8)
    Bp = _round_up(B, tb)                       # pad: no ragged OOB tail
    grid = (Bp // tb,)

    if Bp != B:
        pad = ((0, Bp - B), (0, 0))
        x_t = jnp.pad(x_t, pad)
        y_tm1 = jnp.pad(y_tm1, pad)
        c_tm1 = jnp.pad(c_tm1, pad)

    # ---- operand prep: bf16 MXU operands, f32 everywhere else --------------
    b_f32 = b.astype(jnp.float32)
    fuse_k = (D < 256) and (H < 256)            # tiny K pads the MXU depth; fuse
    if fuse_k:
        mm_ins = (jnp.concatenate([x_t, y_tm1], axis=1).astype(jnp.bfloat16),)
        mm_cols = (D + H,)
        w_ins = (W.astype(jnp.bfloat16), b_f32)
        kernel = _lstm_kernel_fused
    else:
        mm_ins = (x_t.astype(jnp.bfloat16), y_tm1.astype(jnp.bfloat16))
        mm_cols = (D, H)
        w_ins = (W[:D].astype(jnp.bfloat16), W[D:].astype(jnp.bfloat16), b_f32)
        kernel = _lstm_kernel_split

    inputs = (*mm_ins, c_tm1, *w_ins)

    def batch_spec(cols):
        return pl.BlockSpec((tb, cols), lambda i: (i, 0))

    batch_specs = [batch_spec(c) for c in mm_cols] + [batch_spec(H)]
    out_spec = pl.BlockSpec((tb, 2 * H), lambda i: (i, 0))
    out_shape = jax.ShapeDtypeStruct((Bp, 2 * H), out_dtype)

    # ---- explicit VMEM budget: resident weights + double-buffered tiles ----
    w_bytes = sum(int(w.size) * w.dtype.itemsize for w in w_ins)
    io_bytes = 2 * tb * (sum(mm_cols) * 2 + H * 4)                 # bf16 x/y, f32 c
    io_bytes += 2 * tb * 2 * H * jnp.dtype(out_dtype).itemsize     # stacked output
    vmem_limit = int(min(64 << 20, max(32 << 20, 2 * (w_bytes + io_bytes) + (2 << 20))))

    cparams = pltpu.CompilerParams(
        dimension_semantics=("parallel",), vmem_limit_bytes=vmem_limit)

    def build(resident_weights):
        if resident_weights:
            # One fully VMEM-resident copy of each weight/bias: no per-step,
            # double-buffered weight DMA (constant across the grid anyway).
            w_specs = [pl.BlockSpec(memory_space=pltpu.MemorySpace.VMEM)
                       for _ in w_ins]
        else:
            # Fallback: constant-index blocked specs (always supported).
            w_specs = [pl.BlockSpec(w.shape, lambda i: (0, 0)) for w in w_ins]
        return pl.pallas_call(
            kernel,
            out_shape=out_shape,
            grid=grid,
            in_specs=batch_specs + w_specs,
            out_specs=out_spec,
            compiler_params=cparams,
        )

    try:
        out = build(resident_weights=True)(*inputs)
    except Exception:
        # Some jaxlib versions reject unblocked VMEM operands with a grid;
        # fall back to blocked (double-buffered) weights — still correct.
        out = build(resident_weights=False)(*inputs)

    y_t = out[:B, :H]
    c_t = out[:B, H:]
    return y_t, c_t


def lstm_cell_reference(x_t, states, params):
    """Pure-JAX reference of _LSTMCell.forward (defaults: sigmoid gates, tanh)."""
    y_tm1, c_tm1 = states
    H = y_tm1.shape[1]
    xc = jnp.concatenate([x_t, y_tm1], axis=1)
    v = xc @ params["W"] + params["b"]
    forget_g = jax.nn.sigmoid(v[:, 0 * H:1 * H])
    input_g = jax.nn.sigmoid(v[:, 1 * H:2 * H])
    output_g = jax.nn.sigmoid(v[:, 2 * H:3 * H])
    main_g = v[:, 3 * H:4 * H]
    c_t = jnp.tanh(c_tm1 * forget_g + main_g * input_g)
    y_t = c_t * output_g
    return y_t, c_t


if __name__ == "__main__":
    # Small shapes implied by the module: batch=2, indim=16, outdim(hidden)=32.
    B, D, H = 2, 16, 32

    key = jax.random.PRNGKey(0)
    ks = jax.random.split(key, 5)
    params = {
        # W: (indim + outdim, 4*outdim) as in PackedRNUGates; b: (1, 4*outdim)
        "W": 0.1 * jax.random.normal(ks[0], (D + H, 4 * H), jnp.float32),
        "b": 0.01 * jax.random.normal(ks[1], (1, 4 * H), jnp.float32),
    }
    x_t = jax.random.normal(ks[2], (B, D), jnp.float32)
    y_tm1 = jax.random.normal(ks[3], (B, H), jnp.float32)
    c_tm1 = jax.random.normal(ks[4], (B, H), jnp.float32)

    y_t, c_t = jax.block_until_ready(lstm_cell(x_t, (y_tm1, c_tm1), params))

    ref_y, ref_c = lstm_cell_reference(x_t, (y_tm1, c_tm1), params)
    # bf16 MXU operands round each operand to ~2^-9 relative precision, so the
    # comparison against the f32 reference uses a correspondingly loose tol.
    np.testing.assert_allclose(np.asarray(y_t), np.asarray(ref_y),
                               rtol=2e-2, atol=2e-2)
    np.testing.assert_allclose(np.asarray(c_t), np.asarray(ref_c),
                               rtol=2e-2, atol=2e-2)

    assert y_t.shape == (B, H) and c_t.shape == (B, H)
    # TODO(synk): recurrent_batch_norm='full' (SeqBatchNorm1d) and the
    # activation='crelu' non-default constructor options are not implemented.
    # TODO(synk): when this cell is driven by an outer time loop, move the
    # recurrence into the kernel (grid over T with a constant weight index_map
    # or input_output_aliases on y/c) so W stays resident across steps; the
    # single-step forward() implemented here cannot express that.
    print("KERNEL_OK")
</pallas_src>

<mosaic_0001>
module attributes {stable_mosaic.version = 11 : i64} {
  func.func @_lstm_kernel_fused(%arg0: i32, %arg1: memref<8x48xbf16, #tpu.memory_space<vmem>>, %arg2: memref<8x32xf32, #tpu.memory_space<vmem>>, %arg3: memref<48x128xbf16, #tpu.memory_space<vmem>>, %arg4: memref<1x128xf32, #tpu.memory_space<vmem>>, %arg5: memref<8x64xf32, #tpu.memory_space<vmem>>) attributes {dimension_semantics = [#tpu.dimension_semantics<parallel>], iteration_bounds = array<i64: 1>, scalar_prefetch = 0 : i64, scratch_operands = 0 : i64, tpu.core_type = #tpu.core_type<tc>, window_params = [{transform_indices = @transform_0, window_bounds = array<i64: 8, 48>}, {transform_indices = @transform_1, window_bounds = array<i64: 8, 32>}, {pipeline_mode = #tpu.pipeline_mode<synchronous>, transform_indices = @transform_2, window_bounds = array<i64: 48, 128>}, {pipeline_mode = #tpu.pipeline_mode<synchronous>, transform_indices = @transform_3, window_bounds = array<i64: 1, 128>}, {transform_indices = @transform_4, window_bounds = array<i64: 8, 64>}]} {
    %c0 = arith.constant 0 : index
    %c0_0 = arith.constant 0 : index
    %0 = vector.load %arg1[%c0, %c0_0] : memref<8x48xbf16, #tpu.memory_space<vmem>>, vector<8x48xbf16>
    %c0_1 = arith.constant 0 : index
    %c0_2 = arith.constant 0 : index
    %1 = vector.load %arg3[%c0_1, %c0_2] : memref<48x128xbf16, #tpu.memory_space<vmem>>, vector<48x128xbf16>
    %cst = arith.constant dense<0.000000e+00> : vector<8x128xf32>
    %2 = tpu.matmul %0, %1, %cst {dimension_numbers = #tpu.dot_dimension_numbers<[1], [0], [0], [1], [0, 0, 1, 1], [], []>} : vector<8x48xbf16>, vector<48x128xbf16>, vector<8x128xf32> -> vector<8x128xf32>
    %c0_3 = arith.constant 0 : index
    %c0_4 = arith.constant 0 : index
    %3 = vector.load %arg4[%c0_3, %c0_4] : memref<1x128xf32, #tpu.memory_space<vmem>>, vector<1x128xf32>
    %4 = vector.broadcast %3 : vector<1x128xf32> to vector<8x128xf32>
    %5 = arith.addf %2, %4 : vector<8x128xf32>
    %c0_5 = arith.constant 0 : index
    %c0_6 = arith.constant 0 : index
    %6 = vector.load %arg2[%c0_5, %c0_6] : memref<8x32xf32, #tpu.memory_space<vmem>>, vector<8x32xf32>
    %7 = vector.extract_strided_slice %5 {offsets = [0, 0], sizes = [8, 96], strides = [1, 1]} : vector<8x128xf32> to vector<8x96xf32>
    %cst_7 = arith.constant 5.000000e-01 : f32
    %8 = vector.broadcast %cst_7 : f32 to vector<8x96xf32>
    %9 = arith.mulf %8, %7 : vector<8x96xf32>
    %10 = math.tanh %9 : vector<8x96xf32>
    %cst_8 = arith.constant 5.000000e-01 : f32
    %11 = vector.broadcast %cst_8 : f32 to vector<8x96xf32>
    %12 = arith.mulf %11, %10 : vector<8x96xf32>
    %cst_9 = arith.constant 5.000000e-01 : f32
    %13 = vector.broadcast %cst_9 : f32 to vector<8x96xf32>
    %14 = arith.addf %12, %13 : vector<8x96xf32>
    %15 = vector.extract_strided_slice %14 {offsets = [0, 0], sizes = [8, 32], strides = [1, 1]} : vector<8x96xf32> to vector<8x32xf32>
    %16 = vector.extract_strided_slice %14 {offsets = [0, 32], sizes = [8, 32], strides = [1, 1]} : vector<8x96xf32> to vector<8x32xf32>
    %17 = vector.extract_strided_slice %14 {offsets = [0, 64], sizes = [8, 32], strides = [1, 1]} : vector<8x96xf32> to vector<8x32xf32>
    %18 = vector.extract_strided_slice %5 {offsets = [0, 96], sizes = [8, 32], strides = [1, 1]} : vector<8x128xf32> to vector<8x32xf32>
    %19 = arith.mulf %6, %15 : vector<8x32xf32>
    %20 = arith.mulf %18, %16 : vector<8x32xf32>
    %21 = arith.addf %19, %20 : vector<8x32xf32>
    %22 = math.tanh %21 : vector<8x32xf32>
    %23 = arith.mulf %22, %17 : vector<8x32xf32>
    %24 = tpu.concatenate %23, %22 in 1 : vector<8x32xf32>, vector<8x32xf32> -> vector<8x64xf32>
    %c0_10 = arith.constant 0 : index
    %c0_11 = arith.constant 0 : index
    %25 = vector.load %arg5[%c0_10, %c0_11] : memref<8x64xf32, #tpu.memory_space<vmem>>, vector<8x64xf32>
    tpu.vector_store %arg5[%c0_10, %c0_11], %24 {strides = array<i32>} : memref<8x64xf32, #tpu.memory_space<vmem>>, vector<8x64xf32>,
    return
  }
  func.func @transform_0(%arg0: i32) -> (i32, i32) {
    %c0_i32 = arith.constant 0 : i32
    %c0_i32_0 = arith.constant 0 : i32
    return %arg0, %c0_i32 : i32, i32
  }
  func.func @transform_1(%arg0: i32) -> (i32, i32) {
    %c0_i32 = arith.constant 0 : i32
    %c0_i32_0 = arith.constant 0 : i32
    return %arg0, %c0_i32 : i32, i32
  }
  func.func @transform_2(%arg0: i32) -> (i32, i32) {
    %c0_i32 = arith.constant 0 : i32
    %c0_i32_0 = arith.constant 0 : i32
    %c0_i32_1 = arith.constant 0 : i32
    return %c0_i32, %c0_i32_0 : i32, i32
  }
  func.func @transform_3(%arg0: i32) -> (i32, i32) {
    %c0_i32 = arith.constant 0 : i32
    %c0_i32_0 = arith.constant 0 : i32
    %c0_i32_1 = arith.constant 0 : i32
    return %c0_i32, %c0_i32_0 : i32, i32
  }
  func.func @transform_4(%arg0: i32) -> (i32, i32) {
    %c0_i32 = arith.constant 0 : i32
    %c0_i32_0 = arith.constant 0 : i32
    return %arg0, %c0_i32 : i32, i32
  }
}

module attributes {stable_mosaic.version = 11 : i64} {
  func.func @_lstm_kernel_fused(%arg0: i32, %arg1: memref<8x48xbf16, #tpu.memory_space<vmem>>, %arg2: memref<8x32xf32, #tpu.memory_space<vmem>>, %arg3: memref<48x128xbf16, #tpu.memory_space<vmem>>, %arg4: memref<1x128xf32, #tpu.memory_space<vmem>>, %arg5: memref<8x64xf32, #tpu.memory_space<vmem>>) attributes {dimension_semantics = [#tpu.dimension_semantics<parallel>], iteration_bounds = array<i64: 1>, scalar_prefetch = 0 : i64, scratch_operands = 0 : i64, tpu.core_type = #tpu.core_type<tc>, window_params = [{transform_indices = @transform_0, window_bounds = array<i64: 8, 48>}, {transform_indices = @transform_1, window_bounds = array<i64: 8, 32>}, {pipeline_mode = #tpu.pipeline_mode<synchronous>, transform_indices = @transform_2, window_bounds = array<i64: 48, 128>}, {pipeline_mode = #tpu.pipeline_mode<synchronous>, transform_indices = @transform_3, window_bounds = array<i64: 1, 128>}, {transform_indices = @transform_4, window_bounds = array<i64: 8, 64>}]} {
    %c0 = arith.constant 0 : index
    %c0_0 = arith.constant 0 : index
    %0 = vector.load %arg1[%c0, %c0_0] : memref<8x48xbf16, #tpu.memory_space<vmem>>, vector<8x48xbf16>
    %c0_1 = arith.constant 0 : index
    %c0_2 = arith.constant 0 : index
    %1 = vector.load %arg3[%c0_1, %c0_2] : memref<48x128xbf16, #tpu.memory_space<vmem>>, vector<48x128xbf16>
    %cst = arith.constant dense<0.000000e+00> : vector<8x128xf32>
    %2 = tpu.matmul %0, %1, %cst {dimension_numbers = #tpu.dot_dimension_numbers<[1], [0], [0], [1], [0, 0, 1, 1], [], []>} : vector<8x48xbf16>, vector<48x128xbf16>, vector<8x128xf32> -> vector<8x128xf32>
    %c0_3 = arith.constant 0 : index
    %c0_4 = arith.constant 0 : index
    %3 = vector.load %arg4[%c0_3, %c0_4] : memref<1x128xf32, #tpu.memory_space<vmem>>, vector<1x128xf32>
    %4 = vector.broadcast %3 : vector<1x128xf32> to vector<8x128xf32>
    %5 = arith.addf %2, %4 : vector<8x128xf32>
    %c0_5 = arith.constant 0 : index
    %c0_6 = arith.constant 0 : index
    %6 = vector.load %arg2[%c0_5, %c0_6] : memref<8x32xf32, #tpu.memory_space<vmem>>, vector<8x32xf32>
    %7 = vector.extract_strided_slice %5 {offsets = [0, 0], sizes = [8, 96], strides = [1, 1]} : vector<8x128xf32> to vector<8x96xf32>
    %cst_7 = arith.constant 5.000000e-01 : f32
    %8 = vector.broadcast %cst_7 : f32 to vector<8x96xf32>
    %9 = arith.mulf %8, %7 : vector<8x96xf32>
    %10 = math.tanh %9 : vector<8x96xf32>
    %cst_8 = arith.constant 5.000000e-01 : f32
    %11 = vector.broadcast %cst_8 : f32 to vector<8x96xf32>
    %12 = arith.mulf %11, %10 : vector<8x96xf32>
    %cst_9 = arith.constant 5.000000e-01 : f32
    %13 = vector.broadcast %cst_9 : f32 to vector<8x96xf32>
    %14 = arith.addf %12, %13 : vector<8x96xf32>
    %15 = vector.extract_strided_slice %14 {offsets = [0, 0], sizes = [8, 32], strides = [1, 1]} : vector<8x96xf32> to vector<8x32xf32>
    %16 = vector.extract_strided_slice %14 {offsets = [0, 32], sizes = [8, 32], strides = [1, 1]} : vector<8x96xf32> to vector<8x32xf32>
    %17 = vector.extract_strided_slice %14 {offsets = [0, 64], sizes = [8, 32], strides = [1, 1]} : vector<8x96xf32> to vector<8x32xf32>
    %18 = vector.extract_strided_slice %5 {offsets = [0, 96], sizes = [8, 32], strides = [1, 1]} : vector<8x128xf32> to vector<8x32xf32>
    %19 = arith.mulf %6, %15 : vector<8x32xf32>
    %20 = arith.mulf %18, %16 : vector<8x32xf32>
    %21 = arith.addf %19, %20 : vector<8x32xf32>
    %22 = math.tanh %21 : vector<8x32xf32>
    %23 = arith.mulf %22, %17 : vector<8x32xf32>
    %24 = tpu.concatenate %23, %22 in 1 : vector<8x32xf32>, vector<8x32xf32> -> vector<8x64xf32>
    %c0_10 = arith.constant 0 : index
    %c0_11 = arith.constant 0 : index
    %25 = vector.load %arg5[%c0_10, %c0_11] : memref<8x64xf32, #tpu.memory_space<vmem>>, vector<8x64xf32>
    tpu.vector_store %arg5[%c0_10, %c0_11], %24 {strides = array<i32>} : memref<8x64xf32, #tpu.memory_space<vmem>>, vector<8x64xf32>,
    return
  }
  func.func @transform_0(%arg0: i32) -> (i32, i32) {
    %c0_i32 = arith.constant 0 : i32
    %c0_i32_0 = arith.constant 0 : i32
    return %arg0, %c0_i32 : i32, i32
  }
  func.func @transform_1(%arg0: i32) -> (i32, i32) {
    %c0_i32 = arith.constant 0 : i32
    %c0_i32_0 = arith.constant 0 : i32
    return %arg0, %c0_i32 : i32, i32
  }
  func.func @transform_2(%arg0: i32) -> (i32, i32) {
    %c0_i32 = arith.constant 0 : i32
    %c0_i32_0 = arith.constant 0 : i32
    %c0_i32_1 = arith.constant 0 : i32
    return %c0_i32, %c0_i32_0 : i32, i32
  }
  func.func @transform_3(%arg0: i32) -> (i32, i32) {
    %c0_i32 = arith.constant 0 : i32
    %c0_i32_0 = arith.constant 0 : i32
    %c0_i32_1 = arith.constant 0 : i32
    return %c0_i32, %c0_i32_0 : i32, i32
  }
  func.func @transform_4(%arg0: i32) -> (i32, i32) {
    %c0_i32 = arith.constant 0 : i32
    %c0_i32_0 = arith.constant 0 : i32
    return %arg0, %c0_i32 : i32, i32
  }
}

</mosaic_0001>

<bundles_post_ra>
// kernel: tpu_custom_call.1
= control target key start
LH: loop header
LB: loop body
LE: loop exit
PB: predicated region body
PF: predicated region fallthrough
CT: control target
= control target key end

     0   :  { %9 = vsyncpa [#allocation3], 0  ;;  %s329_s0 = inlined_call_operand.hbm [shape: bf16[8,48], index: 0, kind: input, shape index: {}]   ;;  %s330_s1 = inlined_call_operand.hbm [shape: f32[8,32], index: 1, kind: input, shape index: {}]   ;;  %s331_s2 = inlined_call_operand.hbm [shape: bf16[48,128], index: 2, kind: input, shape index: {}]   ;;  %s332_s3 = inlined_call_operand.vmem [shape: f32[1,128], index: 3, kind: input, shape index: {}]   ;;  %s333_s4 = inlined_call_operand.hbm [shape: f32[8,64], index: 4, kind: output, shape index: {}]  }
   0x1   :  { %10 = vsyncpa [#allocation6], 0  ;;  %s28_s17 = sshll.u32 %s330_s1, 4  ;;  %s29_s17 = int_to_ptr.hbm [resolvable:$true] %s28_s17 }
   0x2   :  { %11 = vsyncpa [#allocation4], 0  ;;  %s282_s18 = smov [#allocation5]   ;;  %s17_s22 = sshll.u32 %s329_s0, 4  ;;  %s18_s22 = int_to_ptr.hbm [resolvable:$true] %s17_s22 }
   0x3   :  { %s30_s19 = sshll.u32 %s282_s18, 4  ;;  %s283_s23 = smov [#allocation2]   ;;  %s31_s19 = int_to_ptr.vmem [resolvable:$true] %s30_s19 }
   0x4   :  { %33 = dma.hbm_to_vmem [thread:$0]  %s29_s17, 128, %s31_s19, [#allocation6]  }
   0x5   :  { %s19_s24 = sshll.u32 %s283_s23, 4  ;;  %s38_s27 = sshll.u32 %s331_s2, 4  ;;  %s20_s24 = int_to_ptr.vmem [resolvable:$true] %s19_s24  ;;  %s39_s27 = int_to_ptr.hbm [resolvable:$true] %s38_s27 }
   0x6   :  { %22 = dma.hbm_to_vmem [thread:$0]  %s18_s22, 64, %s20_s24, [#allocation3]  }
   0x7   :  { %s284_s1 = smov [#allocation7]   ;;  %s285_s29 = smov 64  }
   0x8   :  { %s40_s28 = sshll.u32 %s284_s1, 4  ;;  %s286_s30 = smov 4   ;;  %s41_s28 = int_to_ptr.vmem [resolvable:$true] %s40_s28 }
   0x9   :  { %46 = dma.hbm_to_vmem [thread:$0]  %s39_s27, 384, %s41_s28, [#allocation6], %s285_s29, %s285_s29, %s286_s30  }
   0xa   :  { %276 = dma.done.wait [#allocation3], 64  }
   0xb   :  { %277 = vsyncadd [#allocation3], 4294967232 }
   0xc   :  { %278 = dma.done.wait [#allocation6], 512  }
   0xd   :  { %279 = vsyncadd [#allocation6], 4294966784  ;;  %v167_v0 = vld [vmem:[#allocation7 + $0x10] sm:$0xff]  ;;  %v166_v1 = vld [vmem:[#allocation7 + $0x8] sm:$0xff]  ;;  %vm91_vm0 = vcmask 392192   ;;  %s287_s5 = smov 32  }
   0xe   :  { %100 = vmatpush.bf16.msra.mxu0 %v167_v0  ;;  %v165_v2 = vld [vmem:[#allocation7] sm:$0xff]  ;;  %v62_v3 = vld [vmem:[#allocation2] sm:$0xf]  ;;  %v108_v14 = vld [vmem:[#allocation5] sm:$0xff]  ;;  %s141_s9 = sshll.u32 %s333_s4, 4  ;;  %vm130_vm1 = vcmask 261120   ;;  %s142_s9 = int_to_ptr.hbm [resolvable:$true] %s141_s9 }
   0xf   :  { %v175_v4 = vld [vmem:[%s332_s3] ss:$0 sm:$0xff]  ;;  %s288_s3 = smov [#allocation8]   ;;  %vm132_vm2 = vcmask 523264  }
  0x10   :  { %s139_s6 = sshll.u32 %s288_s3, 4  ;;  %s140_s6 = int_to_ptr.vmem [resolvable:$true] %s139_s6 }
  0x12   :  { %101 = vmatpush.bf16.msra.mxu0 %v166_v1 }
  0x16   :  { %102 = vmatpush.bf16.msra.mxu0 %v165_v2 }
  0x19   :  { %164 = vmatmul.msk.bf16.vlgmr.msra.gmra.mxu0 %vm91_vm0, %v62_v3 }
  0x96   :  { %v104_v5 = vpop.f32.mrf.mxu0 }
  0x97   :  { %v105_v6 = vadd.f32 %v175_v4, %v104_v5 }
  0x99   :  { %v109_v7 = vmul.f32 0.5, %v105_v6 }
  0x9b   :  { %176 = vtanh.f32 %v109_v7 }
  0x9e   :  { %v106_v8 = vpop.f32.mrf.mxu0 }
  0xa1   :  { %v177_v9 = vpop.eup %176 }
  0xa2   :  { %v111_v10 = vmul.f32 0.5, %v177_v9 }
  0xa4   :  { %v112_v11 = vadd.f32 0.5, %v111_v10 }
  0xa6   :  { %115 = vrot.lane.b32.xlu0 %v112_v11, %s285_s29  ;;  %v113_v15 = vmul.f32 %v112_v11, %v108_v14 }
 0x118   :  { %v116_v12 = vpop.permute.xlu0 %115 }
 0x119   :  { %v118_v13 = vmul.f32 %v116_v12, %v105_v6 }
 0x11b   :  { %120 = vrot.lane.b32.xlu0 %v118_v13, %s287_s5 }
 0x18d   :  { %v121_v16 = vpop.permute.xlu0 %120 }
 0x18e   :  { %v123_v17 = vadd.f32 %v121_v16, %v113_v15 }
 0x190   :  { %178 = vtanh.f32 %v123_v17 }
 0x196   :  { %v179_v18 = vpop.eup %178 }
 0x197   :  { %127 = vrot.lane.b32.xlu1 %v179_v18, %s287_s5  ;;  %v125_v19 = vmul.f32 %v179_v18, %v116_v12 }
 0x209   :  { %v128_v20 = vpop.permute.xlu1 %127 }
 0x20a   :  { %v131_v21 = vsel %vm130_vm1, %v125_v19, %v128_v20 }
 0x20b   :  { %133 = vst.msk [vmem:[#allocation8] sm:$0xff] %vm132_vm2, %v131_v21 }
 0x20c   :  { %144 = dma.vmem_to_hbm [thread:$0]  %s140_s6, 128, %s142_s9, [#allocation4]  }
 0x20d   :  { %280 = dma.done.wait [#allocation4], 128  }
 0x20e   :  { %281 = vsyncadd [#allocation4], 4294967168 }
 0x20f   :  { %149 = vsyncpa [#allocation3], 1 }
 0x210   :  { %150 = vsyncpa [#allocation6], 1 }
 0x211   :  { %151 = vsyncpa [#allocation4], 1 }

// kernel: tpu_custom_call.1
= control target key start
LH: loop header
LB: loop body
LE: loop exit
PB: predicated region body
PF: predicated region fallthrough
CT: control target
= control target key end

     0   :  { %9 = vsyncpa [#allocation3], 0  ;;  %s329_s0 = inlined_call_operand.hbm [shape: bf16[8,48], index: 0, kind: input, shape index: {}]   ;;  %s330_s1 = inlined_call_operand.hbm [shape: f32[8,32], index: 1, kind: input, shape index: {}]   ;;  %s331_s2 = inlined_call_operand.hbm [shape: bf16[48,128], index: 2, kind: input, shape index: {}]   ;;  %s332_s3 = inlined_call_operand.vmem [shape: f32[1,128], index: 3, kind: input, shape index: {}]   ;;  %s333_s4 = inlined_call_operand.hbm [shape: f32[8,64], index: 4, kind: output, shape index: {}]  }
   0x1   :  { %10 = vsyncpa [#allocation6], 0  ;;  %s28_s17 = sshll.u32 %s330_s1, 4  ;;  %s29_s17 = int_to_ptr.hbm [resolvable:$true] %s28_s17 }
   0x2   :  { %11 = vsyncpa [#allocation4], 0  ;;  %s282_s18 = smov [#allocation5]   ;;  %s17_s22 = sshll.u32 %s329_s0, 4  ;;  %s18_s22 = int_to_ptr.hbm [resolvable:$true] %s17_s22 }
   0x3   :  { %s30_s19 = sshll.u32 %s282_s18, 4  ;;  %s283_s23 = smov [#allocation2]   ;;  %s31_s19 = int_to_ptr.vmem [resolvable:$true] %s30_s19 }
   0x4   :  { %33 = dma.hbm_to_vmem [thread:$0]  %s29_s17, 128, %s31_s19, [#allocation6]  }
   0x5   :  { %s19_s24 = sshll.u32 %s283_s23, 4  ;;  %s38_s27 = sshll.u32 %s331_s2, 4  ;;  %s20_s24 = int_to_ptr.vmem [resolvable:$true] %s19_s24  ;;  %s39_s27 = int_to_ptr.hbm [resolvable:$true] %s38_s27 }
   0x6   :  { %22 = dma.hbm_to_vmem [thread:$0]  %s18_s22, 64, %s20_s24, [#allocation3]  }
   0x7   :  { %s284_s1 = smov [#allocation7]   ;;  %s285_s29 = smov 64  }
   0x8   :  { %s40_s28 = sshll.u32 %s284_s1, 4  ;;  %s286_s30 = smov 4   ;;  %s41_s28 = int_to_ptr.vmem [resolvable:$true] %s40_s28 }
   0x9   :  { %46 = dma.hbm_to_vmem [thread:$0]  %s39_s27, 384, %s41_s28, [#allocation6], %s285_s29, %s285_s29, %s286_s30  }
   0xa   :  { %276 = dma.done.wait [#allocation3], 64  }
   0xb   :  { %277 = vsyncadd [#allocation3], 4294967232 }
   0xc   :  { %278 = dma.done.wait [#allocation6], 512  }
   0xd   :  { %279 = vsyncadd [#allocation6], 4294966784  ;;  %v167_v0 = vld [vmem:[#allocation7 + $0x10] sm:$0xff]  ;;  %v166_v1 = vld [vmem:[#allocation7 + $0x8] sm:$0xff]  ;;  %vm91_vm0 = vcmask 392192   ;;  %s287_s5 = smov 32  }
   0xe   :  { %100 = vmatpush.bf16.msra.mxu0 %v167_v0  ;;  %v165_v2 = vld [vmem:[#allocation7] sm:$0xff]  ;;  %v62_v3 = vld [vmem:[#allocation2] sm:$0xf]  ;;  %v108_v14 = vld [vmem:[#allocation5] sm:$0xff]  ;;  %s141_s9 = sshll.u32 %s333_s4, 4  ;;  %vm130_vm1 = vcmask 261120   ;;  %s142_s9 = int_to_ptr.hbm [resolvable:$true] %s141_s9 }
   0xf   :  { %v175_v4 = vld [vmem:[%s332_s3] ss:$0 sm:$0xff]  ;;  %s288_s3 = smov [#allocation8]   ;;  %vm132_vm2 = vcmask 523264  }
  0x10   :  { %s139_s6 = sshll.u32 %s288_s3, 4  ;;  %s140_s6 = int_to_ptr.vmem [resolvable:$true] %s139_s6 }
  0x12   :  { %101 = vmatpush.bf16.msra.mxu0 %v166_v1 }
  0x16   :  { %102 = vmatpush.bf16.msra.mxu0 %v165_v2 }
  0x19   :  { %164 = vmatmul.msk.bf16.vlgmr.msra.gmra.mxu0 %vm91_vm0, %v62_v3 }
  0x96   :  { %v104_v5 = vpop.f32.mrf.mxu0 }
  0x97   :  { %v105_v6 = vadd.f32 %v175_v4, %v104_v5 }
  0x99   :  { %v109_v7 = vmul.f32 0.5, %v105_v6 }
  0x9b   :  { %176 = vtanh.f32 %v109_v7 }
  0x9e   :  { %v106_v8 = vpop.f32.mrf.mxu0 }
  0xa1   :  { %v177_v9 = vpop.eup %176 }
  0xa2   :  { %v111_v10 = vmul.f32 0.5, %v177_v9 }
  0xa4   :  { %v112_v11 = vadd.f32 0.5, %v111_v10 }
  0xa6   :  { %115 = vrot.lane.b32.xlu0 %v112_v11, %s285_s29  ;;  %v113_v15 = vmul.f32 %v112_v11, %v108_v14 }
 0x118   :  { %v116_v12 = vpop.permute.xlu0 %115 }
 0x119   :  { %v118_v13 = vmul.f32 %v116_v12, %v105_v6 }
 0x11b   :  { %120 = vrot.lane.b32.xlu0 %v118_v13, %s287_s5 }
 0x18d   :  { %v121_v16 = vpop.permute.xlu0 %120 }
 0x18e   :  { %v123_v17 = vadd.f32 %v121_v16, %v113_v15 }
 0x190   :  { %178 = vtanh.f32 %v123_v17 }
 0x196   :  { %v179_v18 = vpop.eup %178 }
 0x197   :  { %127 = vrot.lane.b32.xlu1 %v179_v18, %s287_s5  ;;  %v125_v19 = vmul.f32 %v179_v18, %v116_v12 }
 0x209   :  { %v128_v20 = vpop.permute.xlu1 %127 }
 0x20a   :  { %v131_v21 = vsel %vm130_vm1, %v125_v19, %v128_v20 }
 0x20b   :  { %133 = vst.msk [vmem:[#allocation8] sm:$0xff] %vm132_vm2, %v131_v21 }
 0x20c   :  { %144 = dma.vmem_to_hbm [thread:$0]  %s140_s6, 128, %s142_s9, [#allocation4]  }
 0x20d   :  { %280 = dma.done.wait [#allocation4], 128  }
 0x20e   :  { %281 = vsyncadd [#allocation4], 4294967168 }
 0x20f   :  { %149 = vsyncpa [#allocation3], 1 }
 0x210   :  { %150 = vsyncpa [#allocation6], 1 }
 0x211   :  { %151 = vsyncpa [#allocation4], 1 }

</bundles_post_ra>
